<compile_context>
chip_gen: v6e
topology: v6e:2x2x1
jax: 0.10.0
libtpu: 0.0.40
codegen_flags: <defaults>
</compile_context>

<pallas_src>
import numpy as np
import jax
import jax.numpy as jnp
from jax import lax
from jax.experimental import pallas as pl
from jax.experimental.pallas import tpu as pltpu


def _bottleneck_kernel(x_ref, s1_ref, b1_ref, w1_ref, s2_ref, b2_ref, w2_ref,
                       out_ref):
    # x_ref:  (NB, C, L)   NB whole batch elements, native NCL layout
    # s1/b1:  (1, C)       folded BN1 scale / shift (f32)
    # w1:     (C, IC)      conv1 weight (bf16), pre-transposed
    # s2/b2:  (1, IC)      folded BN2 scale / shift (f32)
    # w2:     (IC, 3*G)    conv2 weight (bf16), tap-major columns [k*G:(k+1)*G]
    # out:    (NB, G, L)   new features only (concat happens outside)
    NB, C, L = x_ref.shape
    G = out_ref.shape[1]
    M = NB * L

    # Relayout NCL -> fused rows (M, C) inside VMEM (XLU work, no HBM pass).
    x = x_ref[...]                                               # (NB, C, L)
    xr = jnp.transpose(x, (0, 2, 1)).reshape(M, C)               # (M, C) f32

    # BN1 (folded affine) + ReLU, then conv1 (k=1) as one channel matmul.
    h1 = jnp.maximum(xr * s1_ref[0] + b1_ref[0], 0.0)            # (M, C)
    y1 = jnp.dot(h1.astype(w1_ref.dtype), w1_ref[...],
                 preferred_element_type=jnp.float32)             # (M, IC)

    # BN2 (folded affine) + ReLU, then conv2 (k=3, pad=1) as ONE matmul whose
    # output holds the three taps side by side: y2[:, k*G:(k+1)*G] is tap k
    # evaluated at the input row position.
    h2 = jnp.maximum(y1 * s2_ref[0] + b2_ref[0], 0.0)            # (M, IC)
    y2 = jnp.dot(h2.astype(w2_ref.dtype), w2_ref[...],
                 preferred_element_type=jnp.float32)             # (M, 3G)

    a = y2[:, 0:G]            # tap 0: out[l] takes it from h[l-1]
    b = y2[:, G:2 * G]        # tap 1: out[l] takes it from h[l]
    c = y2[:, 2 * G:3 * G]    # tap 2: out[l] takes it from h[l+1]

    row = lax.broadcasted_iota(jnp.int32, (M, G), 0)
    pos = row % L             # position within each batch element
    # Non-negative shifts only (shift=M-1 == roll by -1); masks stop the roll
    # from bleeding across batch elements inside the fused row axis.
    a_sh = jnp.where(pos == 0, 0.0, pltpu.roll(a, shift=1, axis=0))
    c_sh = jnp.where(pos == L - 1, 0.0, pltpu.roll(c, shift=M - 1, axis=0))
    out2 = a_sh + b + c_sh                                       # (M, G)

    # Fused rows -> native NCL output layout (NB, G, L).
    out_ref[...] = jnp.transpose(out2.reshape(NB, L, G),
                                 (0, 2, 1)).astype(out_ref.dtype)


def bottleneck_pallas(x_ncl, params, *, batch_blocks=1):
    """x_ncl: (N, C, L) float32.  Returns (N, C + growthRate, L) float32.

    batch_blocks: number of grid steps (each step processes N//batch_blocks
    whole batch elements).  Use 2 on v7x to feed both TensorCores.
    """
    s1, b1, w1, s2, b2, w2_flat = params
    N, C, L = x_ncl.shape
    IC = w1.shape[1]
    G = w2_flat.shape[1] // 3
    assert N % batch_blocks == 0
    NB = N // batch_blocks

    out2_ncl = pl.pallas_call(
        _bottleneck_kernel,
        out_shape=jax.ShapeDtypeStruct((N, G, L), jnp.float32),
        grid_spec=pltpu.PrefetchScalarGridSpec(
            num_scalar_prefetch=0,
            grid=(batch_blocks,),
            in_specs=[
                pl.BlockSpec((NB, C, L), lambda i: (i, 0, 0)),
                pl.BlockSpec((1, C), lambda i: (0, 0)),
                pl.BlockSpec((1, C), lambda i: (0, 0)),
                pl.BlockSpec((C, IC), lambda i: (0, 0)),
                pl.BlockSpec((1, IC), lambda i: (0, 0)),
                pl.BlockSpec((1, IC), lambda i: (0, 0)),
                pl.BlockSpec((IC, 3 * G), lambda i: (0, 0)),
            ],
            out_specs=pl.BlockSpec((NB, G, L), lambda i: (i, 0, 0)),
        ),
        compiler_params=pltpu.CompilerParams(
            dimension_semantics=("parallel",)),
    )(x_ncl, s1, b1, w1, s2, b2, w2_flat)

    # DenseNet concat stays outside the kernel: x is not copied through VMEM.
    return jnp.concatenate([x_ncl, out2_ncl], axis=1)


def make_params(key, nChannels, growthRate, eps=1e-5):
    """Deterministic synthetic parameters matching the PyTorch module shapes."""
    interChannels = 4 * growthRate
    k1, k2 = jax.random.split(key)

    # BatchNorm1d default init (eval mode): gamma=1, beta=0, mean=0, var=1.
    gamma1 = jnp.ones((nChannels,), jnp.float32)
    beta1 = jnp.zeros((nChannels,), jnp.float32)
    mean1 = jnp.zeros((nChannels,), jnp.float32)
    var1 = jnp.ones((nChannels,), jnp.float32)
    gamma2 = jnp.ones((interChannels,), jnp.float32)
    beta2 = jnp.zeros((interChannels,), jnp.float32)
    mean2 = jnp.zeros((interChannels,), jnp.float32)
    var2 = jnp.ones((interChannels,), jnp.float32)

    # Fold BN into scale/shift:  y = x*scale + shift
    scale1 = gamma1 / jnp.sqrt(var1 + eps)
    shift1 = beta1 - mean1 * scale1
    scale2 = gamma2 / jnp.sqrt(var2 + eps)
    shift2 = beta2 - mean2 * scale2

    # Conv weights (deterministic synthetic init; PyTorch layout (out, in, k)).
    w1_oik = jax.random.normal(k1, (interChannels, nChannels, 1),
                               jnp.float32) * 0.1
    w2_oik = jax.random.normal(k2, (growthRate, interChannels, 3),
                               jnp.float32) * 0.1

    # Kernel-friendly layouts (bf16 for the MXU; accumulation stays f32).
    w1 = jnp.transpose(w1_oik[:, :, 0], (1, 0)).astype(jnp.bfloat16)     # (C, IC)
    w2_flat = jnp.transpose(w2_oik, (1, 2, 0)).reshape(
        interChannels, 3 * growthRate).astype(jnp.bfloat16)             # (IC, 3G)

    kernel_params = (scale1.reshape(1, -1), shift1.reshape(1, -1), w1,
                     scale2.reshape(1, -1), shift2.reshape(1, -1), w2_flat)
    torch_like = (scale1, shift1, w1_oik, scale2, shift2, w2_oik)
    return kernel_params, torch_like


def bottleneck_reference(x_ncl, torch_like):
    """Pure-JAX f32 reference replicating the PyTorch forward (NCL layout)."""
    scale1, shift1, w1_oik, scale2, shift2, w2_oik = torch_like
    h1 = jnp.maximum(x_ncl * scale1[None, :, None] + shift1[None, :, None], 0.0)
    y1 = jnp.einsum('oc,ncl->nol', w1_oik[:, :, 0], h1)
    h2 = jnp.maximum(y1 * scale2[None, :, None] + shift2[None, :, None], 0.0)
    hp = jnp.pad(h2, ((0, 0), (0, 0), (1, 1)))
    L = x_ncl.shape[2]
    taps = jnp.stack([hp[:, :, k:k + L] for k in range(3)], axis=-1)  # (N,IC,L,3)
    out2 = jnp.einsum('ock,nclk->nol', w2_oik, taps)
    return jnp.concatenate([x_ncl, out2], axis=1)


if __name__ == "__main__":
    nChannels, growthRate = 4, 4     # interChannels = 16
    N, L = 2, 16

    key = jax.random.PRNGKey(0)
    kx, kp = jax.random.split(key)
    x = jax.random.normal(kx, (N, nChannels, L), jnp.float32)   # NCL like PyTorch

    kernel_params, torch_like = make_params(kp, nChannels, growthRate)

    out = bottleneck_pallas(x, kernel_params)
    out = jax.block_until_ready(out)

    ref = bottleneck_reference(x, torch_like)
    # bf16 matmul operands (f32 accumulation) -> relaxed tolerance vs f32 ref.
    np.testing.assert_allclose(np.asarray(out), np.asarray(ref),
                               rtol=2e-2, atol=2e-2)
    assert out.shape == (N, nChannels + growthRate, L)
    print("KERNEL_OK")
</pallas_src>

<mosaic_0001>
module attributes {stable_mosaic.version = 11 : i64} {
  func.func @_bottleneck_kernel(%arg0: i32, %arg1: memref<2x4x16xf32, #tpu.memory_space<vmem>>, %arg2: memref<1x4xf32, #tpu.memory_space<vmem>>, %arg3: memref<1x4xf32, #tpu.memory_space<vmem>>, %arg4: memref<4x16xbf16, #tpu.memory_space<vmem>>, %arg5: memref<1x16xf32, #tpu.memory_space<vmem>>, %arg6: memref<1x16xf32, #tpu.memory_space<vmem>>, %arg7: memref<16x12xbf16, #tpu.memory_space<vmem>>, %arg8: memref<2x4x16xf32, #tpu.memory_space<vmem>>) attributes {dimension_semantics = [#tpu.dimension_semantics<parallel>], iteration_bounds = array<i64: 1>, scalar_prefetch = 0 : i64, scratch_operands = 0 : i64, tpu.core_type = #tpu.core_type<tc>, window_params = [{transform_indices = @transform_0, window_bounds = array<i64: 2, 4, 16>}, {pipeline_mode = #tpu.pipeline_mode<synchronous>, transform_indices = @transform_1, window_bounds = array<i64: 1, 4>}, {pipeline_mode = #tpu.pipeline_mode<synchronous>, transform_indices = @transform_2, window_bounds = array<i64: 1, 4>}, {pipeline_mode = #tpu.pipeline_mode<synchronous>, transform_indices = @transform_3, window_bounds = array<i64: 4, 16>}, {pipeline_mode = #tpu.pipeline_mode<synchronous>, transform_indices = @transform_4, window_bounds = array<i64: 1, 16>}, {pipeline_mode = #tpu.pipeline_mode<synchronous>, transform_indices = @transform_5, window_bounds = array<i64: 1, 16>}, {pipeline_mode = #tpu.pipeline_mode<synchronous>, transform_indices = @transform_6, window_bounds = array<i64: 16, 12>}, {transform_indices = @transform_7, window_bounds = array<i64: 2, 4, 16>}]} {
    %c0 = arith.constant 0 : index
    %c0_0 = arith.constant 0 : index
    %c0_1 = arith.constant 0 : index
    %0 = vector.load %arg1[%c0, %c0_0, %c0_1] : memref<2x4x16xf32, #tpu.memory_space<vmem>>, vector<2x4x16xf32>
    %1 = tpu.transpose %0, [0, 2, 1] : vector<2x4x16xf32> -> vector<2x16x4xf32>
    %2 = vector.shape_cast %1 : vector<2x16x4xf32> to vector<32x4xf32>
    %c0_2 = arith.constant 0 : index
    %c0_3 = arith.constant 0 : index
    %3 = vector.load %arg2[%c0_2, %c0_3] : memref<1x4xf32, #tpu.memory_space<vmem>>, vector<1x4xf32>
    %4 = vector.shape_cast %3 : vector<1x4xf32> to vector<4xf32>
    %5 = vector.shape_cast %4 : vector<4xf32> to vector<1x4xf32>
    %6 = vector.broadcast %5 : vector<1x4xf32> to vector<32x4xf32>
    %7 = arith.mulf %2, %6 : vector<32x4xf32>
    %c0_4 = arith.constant 0 : index
    %c0_5 = arith.constant 0 : index
    %8 = vector.load %arg3[%c0_4, %c0_5] : memref<1x4xf32, #tpu.memory_space<vmem>>, vector<1x4xf32>
    %9 = vector.shape_cast %8 : vector<1x4xf32> to vector<4xf32>
    %10 = vector.shape_cast %9 : vector<4xf32> to vector<1x4xf32>
    %11 = vector.broadcast %10 : vector<1x4xf32> to vector<32x4xf32>
    %12 = arith.addf %7, %11 : vector<32x4xf32>
    %cst = arith.constant 0.000000e+00 : f32
    %13 = vector.broadcast %cst : f32 to vector<32x4xf32>
    %14 = arith.maximumf %12, %13 : vector<32x4xf32>
    %15 = arith.truncf %14 : vector<32x4xf32> to vector<32x4xbf16>
    %c0_6 = arith.constant 0 : index
    %c0_7 = arith.constant 0 : index
    %16 = vector.load %arg4[%c0_6, %c0_7] : memref<4x16xbf16, #tpu.memory_space<vmem>>, vector<4x16xbf16>
    %cst_8 = arith.constant dense<0.000000e+00> : vector<32x16xf32>
    %17 = tpu.matmul %15, %16, %cst_8 {dimension_numbers = #tpu.dot_dimension_numbers<[1], [0], [0], [1], [0, 0, 1, 1], [], []>} : vector<32x4xbf16>, vector<4x16xbf16>, vector<32x16xf32> -> vector<32x16xf32>
    %c0_9 = arith.constant 0 : index
    %c0_10 = arith.constant 0 : index
    %18 = vector.load %arg5[%c0_9, %c0_10] : memref<1x16xf32, #tpu.memory_space<vmem>>, vector<1x16xf32>
    %19 = vector.shape_cast %18 : vector<1x16xf32> to vector<16xf32>
    %20 = vector.shape_cast %19 : vector<16xf32> to vector<1x16xf32>
    %21 = vector.broadcast %20 : vector<1x16xf32> to vector<32x16xf32>
    %22 = arith.mulf %17, %21 : vector<32x16xf32>
    %c0_11 = arith.constant 0 : index
    %c0_12 = arith.constant 0 : index
    %23 = vector.load %arg6[%c0_11, %c0_12] : memref<1x16xf32, #tpu.memory_space<vmem>>, vector<1x16xf32>
    %24 = vector.shape_cast %23 : vector<1x16xf32> to vector<16xf32>
    %25 = vector.shape_cast %24 : vector<16xf32> to vector<1x16xf32>
    %26 = vector.broadcast %25 : vector<1x16xf32> to vector<32x16xf32>
    %27 = arith.addf %22, %26 : vector<32x16xf32>
    %cst_13 = arith.constant 0.000000e+00 : f32
    %28 = vector.broadcast %cst_13 : f32 to vector<32x16xf32>
    %29 = arith.maximumf %27, %28 : vector<32x16xf32>
    %30 = arith.truncf %29 : vector<32x16xf32> to vector<32x16xbf16>
    %c0_14 = arith.constant 0 : index
    %c0_15 = arith.constant 0 : index
    %31 = vector.load %arg7[%c0_14, %c0_15] : memref<16x12xbf16, #tpu.memory_space<vmem>>, vector<16x12xbf16>
    %cst_16 = arith.constant dense<0.000000e+00> : vector<32x12xf32>
    %32 = tpu.matmul %30, %31, %cst_16 {dimension_numbers = #tpu.dot_dimension_numbers<[1], [0], [0], [1], [0, 0, 1, 1], [], []>} : vector<32x16xbf16>, vector<16x12xbf16>, vector<32x12xf32> -> vector<32x12xf32>
    %33 = vector.extract_strided_slice %32 {offsets = [0, 0], sizes = [32, 4], strides = [1, 1]} : vector<32x12xf32> to vector<32x4xf32>
    %34 = vector.extract_strided_slice %32 {offsets = [0, 4], sizes = [32, 4], strides = [1, 1]} : vector<32x12xf32> to vector<32x4xf32>
    %35 = vector.extract_strided_slice %32 {offsets = [0, 8], sizes = [32, 4], strides = [1, 1]} : vector<32x12xf32> to vector<32x4xf32>
    %36 = tpu.iota {dimensions = array<i32: 0>} : vector<32x4xi32>
    %c16_i32 = arith.constant 16 : i32
    %c0_i32 = arith.constant 0 : i32
    %37 = arith.cmpi eq, %c16_i32, %c0_i32 : i32
    %c1_i32 = arith.constant 1 : i32
    %38 = arith.select %37, %c1_i32, %c16_i32 : i32
    %39 = vector.broadcast %38 : i32 to vector<32x4xi32>
    %40 = arith.remsi %36, %39 : vector<32x4xi32>
    %c0_i32_17 = arith.constant 0 : i32
    %41 = vector.broadcast %c0_i32_17 : i32 to vector<32x4xi32>
    %42 = arith.cmpi ne, %40, %41 : vector<32x4xi32>
    %c0_i32_18 = arith.constant 0 : i32
    %43 = vector.broadcast %c0_i32_18 : i32 to vector<32x4xi32>
    %44 = arith.cmpi slt, %40, %43 : vector<32x4xi32>
    %c0_i32_19 = arith.constant 0 : i32
    %45 = arith.cmpi slt, %38, %c0_i32_19 : i32
    %46 = vector.broadcast %45 : i1 to vector<32x4xi1>
    %47 = vector.broadcast %46 : vector<32x4xi1> to vector<32x4xi1>
    %48 = arith.xori %44, %47 : vector<32x4xi1>
    %49 = arith.andi %48, %42 : vector<32x4xi1>
    %50 = vector.broadcast %38 : i32 to vector<32x4xi32>
    %51 = arith.addi %40, %50 : vector<32x4xi32>
    %52 = arith.select %49, %51, %40 : vector<32x4xi1>, vector<32x4xi32>
    %c0_i32_20 = arith.constant 0 : i32
    %53 = vector.broadcast %c0_i32_20 : i32 to vector<32x4xi32>
    %54 = arith.cmpi eq, %52, %53 : vector<32x4xi32>
    %c1_i32_21 = arith.constant 1 : i32
    %55 = tpu.dynamic_rotate %33 by %c1_i32_21 dim 0 : vector<32x4xf32>, i32 -> vector<32x4xf32>
    %cst_22 = arith.constant 0.000000e+00 : f32
    %56 = vector.broadcast %cst_22 : f32 to vector<32x4xf32>
    %57 = arith.select %54, %56, %55 : vector<32x4xi1>, vector<32x4xf32>
    %c15_i32 = arith.constant 15 : i32
    %58 = vector.broadcast %c15_i32 : i32 to vector<32x4xi32>
    %59 = arith.cmpi eq, %52, %58 : vector<32x4xi32>
    %c31_i32 = arith.constant 31 : i32
    %60 = tpu.dynamic_rotate %35 by %c31_i32 dim 0 : vector<32x4xf32>, i32 -> vector<32x4xf32>
    %cst_23 = arith.constant 0.000000e+00 : f32
    %61 = vector.broadcast %cst_23 : f32 to vector<32x4xf32>
    %62 = arith.select %59, %61, %60 : vector<32x4xi1>, vector<32x4xf32>
    %63 = arith.addf %57, %34 : vector<32x4xf32>
    %64 = arith.addf %63, %62 : vector<32x4xf32>
    %65 = vector.shape_cast %64 : vector<32x4xf32> to vector<2x16x4xf32>
    %66 = tpu.transpose %65, [0, 2, 1] : vector<2x16x4xf32> -> vector<2x4x16xf32>
    %c0_24 = arith.constant 0 : index
    %c0_25 = arith.constant 0 : index
    %c0_26 = arith.constant 0 : index
    %67 = vector.load %arg8[%c0_24, %c0_25, %c0_26] : memref<2x4x16xf32, #tpu.memory_space<vmem>>, vector<2x4x16xf32>
    tpu.vector_store %arg8[%c0_24, %c0_25, %c0_26], %66 {strides = array<i32>} : memref<2x4x16xf32, #tpu.memory_space<vmem>>, vector<2x4x16xf32>,
    return
  }
  func.func @transform_0(%arg0: i32) -> (i32, i32, i32) {
    %c0_i32 = arith.constant 0 : i32
    %c0_i32_0 = arith.constant 0 : i32
    %c0_i32_1 = arith.constant 0 : i32
    return %arg0, %c0_i32, %c0_i32_0 : i32, i32, i32
  }
  func.func @transform_1(%arg0: i32) -> (i32, i32) {
    %c0_i32 = arith.constant 0 : i32
    %c0_i32_0 = arith.constant 0 : i32
    %c0_i32_1 = arith.constant 0 : i32
    return %c0_i32, %c0_i32_0 : i32, i32
  }
  func.func @transform_2(%arg0: i32) -> (i32, i32) {
    %c0_i32 = arith.constant 0 : i32
    %c0_i32_0 = arith.constant 0 : i32
    %c0_i32_1 = arith.constant 0 : i32
    return %c0_i32, %c0_i32_0 : i32, i32
  }
  func.func @transform_3(%arg0: i32) -> (i32, i32) {
    %c0_i32 = arith.constant 0 : i32
    %c0_i32_0 = arith.constant 0 : i32
    %c0_i32_1 = arith.constant 0 : i32
    return %c0_i32, %c0_i32_0 : i32, i32
  }
  func.func @transform_4(%arg0: i32) -> (i32, i32) {
    %c0_i32 = arith.constant 0 : i32
    %c0_i32_0 = arith.constant 0 : i32
    %c0_i32_1 = arith.constant 0 : i32
    return %c0_i32, %c0_i32_0 : i32, i32
  }
  func.func @transform_5(%arg0: i32) -> (i32, i32) {
    %c0_i32 = arith.constant 0 : i32
    %c0_i32_0 = arith.constant 0 : i32
    %c0_i32_1 = arith.constant 0 : i32
    return %c0_i32, %c0_i32_0 : i32, i32
  }
  func.func @transform_6(%arg0: i32) -> (i32, i32) {
    %c0_i32 = arith.constant 0 : i32
    %c0_i32_0 = arith.constant 0 : i32
    %c0_i32_1 = arith.constant 0 : i32
    return %c0_i32, %c0_i32_0 : i32, i32
  }
  func.func @transform_7(%arg0: i32) -> (i32, i32, i32) {
    %c0_i32 = arith.constant 0 : i32
    %c0_i32_0 = arith.constant 0 : i32
    %c0_i32_1 = arith.constant 0 : i32
    return %arg0, %c0_i32, %c0_i32_0 : i32, i32, i32
  }
}

</mosaic_0001>

<bundles_post_ra>
// kernel: tpu_custom_call.1
= control target key start
LH: loop header
LB: loop body
LE: loop exit
PB: predicated region body
PF: predicated region fallthrough
CT: control target
= control target key end

     0   :  { %12 = vsyncpa [#allocation3], 0  ;;  %s796_s0 = inlined_call_operand.hbm [shape: f32[2,4,16], index: 0, kind: input, shape index: {}]   ;;  %s797_s1 = inlined_call_operand.hbm [shape: f32[1,4], index: 1, kind: input, shape index: {}]   ;;  %s798_s2 = inlined_call_operand.hbm [shape: f32[1,4], index: 2, kind: input, shape index: {}]   ;;  %s799_s3 = inlined_call_operand.vmem [shape: bf16[4,16], index: 3, kind: input, shape index: {}]   ;;  %s800_s4 = inlined_call_operand.hbm [shape: f32[1,16], index: 4, kind: input, shape index: {}]   ;;  %s801_s5 = inlined_call_operand.hbm [shape: f32[1,16], index: 5, kind: input, shape index: {}]   ;;  %s802_s6 = inlined_call_operand.vmem [shape: bf16[16,12], index: 6, kind: input, shape index: {}]   ;;  %s803_s7 = inlined_call_operand.hbm [shape: f32[2,4,16], index: 7, kind: output, shape index: {}]  }
   0x1   :  { %13 = vsyncpa [#allocation6], 0 }
   0x2   :  { %14 = vsyncpa [#allocation9], 0 }
   0x3   :  { %15 = vsyncpa [#allocation4], 0  ;;  %s712_s24 = smov [#allocation5]   ;;  %s713_s26 = smov [#allocation8]  }
   0x4   :  { %s34_s25 = sshll.u32 %s712_s24, 4  ;;  %s56_s27 = sshll.u32 %s713_s26, 4  ;;  %s35_s25 = int_to_ptr.vmem [resolvable:$true] %s34_s25  ;;  %s57_s27 = int_to_ptr.vmem [resolvable:$true] %s56_s27 }
   0x5   :  { %s592_s28 = scalar_lea.vmem %s35_s25, 16  ;;  %s596_s29 = scalar_lea.vmem %s35_s25, 32 }
   0x6   :  { %p593_p0 = scmp.ne.s32.totalorder %s35_s25, %s592_s28  ;;  %p597_p1 = scmp.lt.s32.totalorder %s35_s25, %s35_s25 }
   0x7   :  { %p598_p2 = scmp.lt.s32.totalorder %s596_s29, %s592_s28 }
   0x9   :  { %p599_p3 = por %p598_p2, %p597_p1 }
   0xb   :  { %p600_p4 = pnand %p599_p3, %p593_p0 }
   0xd   :  { %603 = shalt.err (!%p600_p4)
}
   0xe   :  { %37 = dma.hbm_to_vmem [thread:$0]  %s797_s1, 16, %s35_s25, [#allocation6]  }
   0xf   :  { %s612_s9 = scalar_lea.vmem %s57_s27, 16  ;;  %s616_s10 = scalar_lea.vmem %s57_s27, 32 }
  0x10   :  { %p613_p5 = scmp.ne.s32.totalorder %s57_s27, %s612_s9  ;;  %p617_p6 = scmp.lt.s32.totalorder %s57_s27, %s57_s27 }
  0x11   :  { %p618_p7 = scmp.lt.s32.totalorder %s616_s10, %s612_s9 }
  0x13   :  { %p619_p8 = por %p618_p7, %p617_p6 }
  0x15   :  { %p620_p9 = pnand %p619_p8, %p613_p5 }
  0x17   :  { %623 = shalt.err (!%p620_p9)
}
  0x18   :  { %59 = dma.hbm_to_vmem [thread:$0]  %s800_s4, 16, %s57_s27, [#allocation9]  }
  0x19   :  { %s714_s13 = smov [#allocation2]  }
  0x1a   :  { %s21_s14 = sshll.u32 %s714_s13, 4  ;;  %s22_s14 = int_to_ptr.vmem [resolvable:$true] %s21_s14 }
  0x1b   :  { %s632_s15 = scalar_lea.vmem %s22_s14, 128  ;;  %p637_p11 = scmp.lt.s32.totalorder %s22_s14, %s22_s14 }
  0x1c   :  { %p633_p10 = scmp.ne.s32.totalorder %s22_s14, %s632_s15  ;;  %p638_p12 = scmp.lt.s32.totalorder %s632_s15, %s632_s15 }
  0x1e   :  { %p639_p13 = por %p638_p12, %p637_p11 }
  0x20   :  { %p640_p0 = pnand %p639_p13, %p633_p10 }
  0x22   :  { %643 = shalt.err (!%p640_p0)
}
  0x23   :  { %s715_s1 = smov 64   ;;  %s716_s16 = smov 4  }
  0x24   :  { %27 = dma.hbm_to_vmem [thread:$0]  %s796_s0, 128, %s22_s14, [#allocation3], %s715_s1, %s715_s1, %s716_s16  }
  0x25   :  { %s717_s4 = smov [#allocation7]   ;;  %s718_s20 = smov [#allocation10]  }
  0x26   :  { %s44_s19 = sshll.u32 %s717_s4, 4  ;;  %s66_s21 = sshll.u32 %s718_s20, 4  ;;  %s45_s19 = int_to_ptr.vmem [resolvable:$true] %s44_s19  ;;  %s67_s21 = int_to_ptr.vmem [resolvable:$true] %s66_s21 }
  0x27   :  { %s652_s22 = scalar_lea.vmem %s45_s19, 16  ;;  %s656_s23 = scalar_lea.vmem %s45_s19, 32 }
  0x28   :  { %p653_p1 = scmp.ne.s32.totalorder %s45_s19, %s652_s22  ;;  %p657_p2 = scmp.lt.s32.totalorder %s45_s19, %s45_s19 }
  0x29   :  { %p658_p3 = scmp.lt.s32.totalorder %s656_s23, %s652_s22 }
  0x2b   :  { %p659_p4 = por %p658_p3, %p657_p2 }
  0x2d   :  { %p660_p5 = pnand %p659_p4, %p653_p1 }
  0x2f   :  { %663 = shalt.err (!%p660_p5)
}
  0x30   :  { %47 = dma.hbm_to_vmem [thread:$0]  %s798_s2, 16, %s45_s19, [#allocation6]  }
  0x31   :  { %s672_s26 = scalar_lea.vmem %s67_s21, 16  ;;  %s676_s0 = scalar_lea.vmem %s67_s21, 32 }
  0x32   :  { %p673_p6 = scmp.ne.s32.totalorder %s67_s21, %s672_s26  ;;  %p677_p7 = scmp.lt.s32.totalorder %s67_s21, %s67_s21 }
  0x33   :  { %p678_p8 = scmp.lt.s32.totalorder %s676_s0, %s672_s26 }
  0x35   :  { %p679_p9 = por %p678_p8, %p677_p7 }
  0x37   :  { %p680_p10 = pnand %p679_p9, %p673_p6 }
  0x39   :  { %683 = shalt.err (!%p680_p10)
}
  0x3a   :  { %69 = dma.hbm_to_vmem [thread:$0]  %s801_s5, 16, %s67_s21, [#allocation9]  }
  0x3b   :  { %704 = dma.done.wait [#allocation3], 128  }
  0x3c   :  { %705 = vsyncadd [#allocation3], 4294967168 }
  0x3d   :  { %706 = dma.done.wait [#allocation6], 32  }
  0x3e   :  { %707 = vsyncadd [#allocation6], 4294967264 }
  0x3f   :  { %708 = dma.done.wait [#allocation9], 32  }
  0x40   :  { %709 = vsyncadd [#allocation9], 4294967264  ;;  %v88_v0 = vld [vmem:[#allocation2] sm:$0xf]  ;;  %v89_v1 = vld [vmem:[#allocation2 + $0x4] sm:$0xf]  ;;  %v335_v45 = vlaneseq }
  0x41   :  { %90 = vxpose.xlu0.b32.start.end [1/1] (short) (narrow) %v88_v0, 16  ;;  %v182_v2 = vld [vmem:[%s799_s3] sm:$0x3]  ;;  %vm190_vm0 = vcmask 1041408   ;;  %v544_v4 = vld [vmem:[#allocation5] ss:$0 sm:$0xff] }
  0x42   :  { %571 = vmatprep.subr.msk.bf16.mxu0 %vm190_vm0, %v182_v2  ;;  %v192_v3 = vsel %vm190_vm0, %v182_v2, 0  ;;  %v545_v7 = vld [vmem:[#allocation7] ss:$0 sm:$0xff]  ;;  %vm183_vm1 = vcmask 31744   ;;  %v583_v24 = vld [vmem:[%s802_s6] sm:$0xff]   ;;  %vm279_vm2 = vcmask 130048  }
  0x43   :  { %560 = vmatpush3.bf16.msra.mxu0 %v192_v3  ;;  %565 = vmatprep.subr.bf16.mxu1 %v583_v24  ;;  %v548_v26 = vld [vmem:[#allocation8] ss:$0 sm:$0xff]  ;;  %v549_v31 = vld [vmem:[#allocation10] ss:$0 sm:$0xff]  ;;  %v336_v47 = vshrl.u32 %v335_v45, 7  ;;  %s719_s6 = smov 120  }
  0x44   :  { %566 = vmatpush3.bf16.msra.mxu1 %v583_v24  ;;  %s720_s30 = smov 124   ;;  %vm522_vm9 = vcmask 125952   ;;  %s721_s8 = smov [#allocation11]  }
  0x45   :  { %vm396_vm3 = vcmp.lt.s32.totalorder %v336_v47, 1  ;;  %v338_v60 = vadd.s32 16, %v336_v47  ;;  %v344_v2 = vand.u32 15, %v336_v47  ;;  %vm429_vm5 = vcmp.lt.s32.totalorder %v336_v47, 7  ;;  %s530_s9 = sshll.u32 %s721_s8, 4  ;;  %s531_s9 = int_to_ptr.vmem [resolvable:$true] %s530_s9 }
  0x46   :  { %122 = vxpose.xlu0.b32.start.end [1/1] (short) (narrow) %v89_v1, 16  ;;  %v337_v3 = vadd.s32 8, %v336_v47  ;;  %s684_s10 = scalar_lea.vmem %s531_s9, 128  ;;  %p689_p12 = scmp.lt.s32.totalorder %s531_s9, %s531_s9 }
  0x47   :  { %v358_v62 = vand.u32 15, %v338_v60  ;;  %vm388_vm6 = vcmp.eq.s32.totalorder %v344_v2, 0  ;;  %p685_p11 = scmp.ne.s32.totalorder %s531_s9, %s684_s10  ;;  %p690_p13 = scmp.lt.s32.totalorder %s684_s10, %s684_s10 }
  0x49   :  { %vm390_vm4 = vcmp.eq.s32.totalorder %v358_v62, 0  ;;  %p691_p0 = por %p690_p13, %p689_p12 }
  0x4b   :  { %p692_p1 = pnand %p691_p0, %p685_p11 }
  0xbd   :  { %v106_v5 = vpop.trf.xlu0 }
  0xbe   :  { %v161_v6 = vmul.f32 %v544_v4, %v106_v5 }
  0xc0   :  { %v172_v9 = vadd.f32 %v545_v7, %v161_v6 }
  0xc1   :  { %v107_v8 = vpop.trf.xlu0 }
  0xc2   :  { %v162_v10 = vmul.f32 %v544_v4, %v107_v8  ;;  %v176_v13 = vmax.f32 %v172_v9, 0.0 }
  0xc4   :  { %v173_v11 = vadd.f32 %v545_v7, %v162_v10  ;;  %v351_v10 = vand.u32 15, %v337_v3 }
  0xc5   :  { %v138_v12 = vpop.trf.xlu0 }
  0xc6   :  { %v177_v14 = vmax.f32 %v173_v11, 0.0  ;;  %v163_v15 = vmul.f32 %v544_v4, %v138_v12  ;;  %v339_v11 = vadd.s32 24, %v336_v47  ;;  %vm406_vm7 = vcmp.eq.s32.totalorder %v351_v10, 15 }
  0xc8   :  { %v180_v16 = vpack.c.bf16 %v177_v14, %v176_v13  ;;  %v174_v18 = vadd.f32 %v545_v7, %v163_v15 }
  0xc9   :  { %v139_v17 = vpop.trf.xlu0 }
  0xca   :  { %v164_v19 = vmul.f32 %v544_v4, %v139_v17  ;;  %561 = vmatprep.mubr.msk.bf16.mxu0 %vm183_vm1, %v180_v16  ;;  %v178_v21 = vmax.f32 %v174_v18, 0.0 }
  0xcc   :  { %v175_v20 = vadd.f32 %v545_v7, %v164_v19  ;;  %v365_v19 = vand.u32 15, %v339_v11 }
  0xce   :  { %v179_v22 = vmax.f32 %v175_v20, 0.0  ;;  %vm408_vm8 = vcmp.eq.s32.totalorder %v365_v19, 15 }
  0xd0   :  { %v181_v23 = vpack.c.bf16 %v179_v22, %v178_v21 }
  0xd2   :  { %562 = vmatmul.mubr.msk.bf16.vlgmr.msra.gmra.mxu0 %vm183_vm1, %v181_v23 }
 0x192   :  { %v563_v25 = vpop.f32.mrf.mxu0 }
 0x193   :  { %v252_v29 = vmul.f32 %v563_v25, %v548_v26 }
 0x194   :  { %v228_v27 = vpop.f32.mrf.mxu0 }
 0x195   :  { %v250_v28 = vmul.f32 %v548_v26, %v228_v27  ;;  %v263_v37 = vadd.f32 %v549_v31, %v252_v29 }
 0x196   :  { %v564_v30 = vpop.f32.mrf.mxu0 }
 0x197   :  { %v253_v32 = vmul.f32 %v564_v30, %v548_v26  ;;  %v261_v34 = vadd.f32 %v549_v31, %v250_v28  ;;  %v267_v42 = vmax.f32 %v263_v37, 0.0 }
 0x198   :  { %v231_v33 = vpop.f32.mrf.mxu0 }
 0x199   :  { %v264_v35 = vadd.f32 %v549_v31, %v253_v32  ;;  %v251_v36 = vmul.f32 %v548_v26, %v231_v33  ;;  %v265_v40 = vmax.f32 %v261_v34, 0.0 }
 0x19b   :  { %v262_v38 = vadd.f32 %v549_v31, %v251_v36  ;;  %v268_v39 = vmax.f32 %v264_v35, 0.0 }
 0x19d   :  { %v266_v41 = vmax.f32 %v262_v38, 0.0  ;;  %v270_v44 = vpack.c.bf16 %v268_v39, %v267_v42 }
 0x19f   :  { %v269_v43 = vpack.c.bf16 %v266_v41, %v265_v40 }
 0x1a1   :  { %567 = vmatprep.mubr.msk.bf16.mxu1 %vm279_vm2, %v269_v43 }
 0x1a2   :  { %568 = vmatmul.mubr.msk.bf16.vlgmr.msra.gmra.mxu1 %vm279_vm2, %v270_v44 }
 0x262   :  { %v569_v46 = vpop.f32.mrf.mxu1 }
 0x263   :  { %417 = vrot.lane.b32.xlu1 %v569_v46, %s719_s6  ;;  %v394_v50 = vrot.slane %v569_v46, 7 }
 0x264   :  { %v320_v48 = vpop.f32.mrf.mxu1 }
 0x265   :  { %v392_v51 = vrot.slane %v320_v48, 7 }
 0x266   :  { %v570_v49 = vpop.f32.mrf.mxu1 }
 0x267   :  { %v395_v52 = vrot.slane %v570_v49, 7  ;;  %413 = vrot.lane.b32.xlu1 %v320_v48, %s719_s6  ;;  %419 = vrot.lane.b32.xlu0 %v570_v49, %s719_s6 }
 0x268   :  { %v323_v53 = vpop.f32.mrf.mxu1 }
 0x269   :  { %v393_v54 = vrot.slane %v323_v53, 7  ;;  %v400_v55 = vsel %vm396_vm3, %v395_v52, %v392_v51  ;;  %v397_v56 = vsel %vm396_vm3, %v394_v50, %v395_v52 }
 0x26a   :  { %v401_v14 = vsel %vm388_vm6, 0.0, %v400_v55 }
 0x26b   :  { %438 = vrot.lane.b32.xlu1 %v320_v48, %s720_s30  ;;  %v398_v57 = vsel %vm396_vm3, %v393_v54, %v394_v50  ;;  %v399_v58 = vsel %vm396_vm3, %v392_v51, %v393_v54 }
 0x26c   :  { %v403_v6 = vsel %vm390_vm4, 0.0, %v398_v57 }
 0x26f   :  { %442 = vrot.lane.b32.xlu1 %v569_v46, %s720_s30 }
 0x273   :  { %415 = vrot.lane.b32.xlu1 %v323_v53, %s719_s6 }
 0x277   :  { %440 = vrot.lane.b32.xlu1 %v323_v53, %s720_s30 }
 0x27b   :  { %444 = vrot.lane.b32.xlu1 %v570_v49, %s720_s30 }
 0x2d5   :  { %v418_v59 = vpop.permute.xlu1 %417 }
 0x2d6   :  { %v427_v4 = vrot.slane %v418_v59, 1 }
 0x2d9   :  { %v414_v61 = vpop.permute.xlu1 %413  ;;  %v420_v63 = vpop.permute.xlu0 %419 }
 0x2da   :  { %v428_v1 = vrot.slane %v420_v63, 1  ;;  %v425_v13 = vrot.slane %v414_v61, 1 }
 0x2dc   :  { %v430_v8 = vsel %vm429_vm5, %v427_v4, %v428_v1  ;;  %v433_v25 = vsel %vm429_vm5, %v428_v1, %v425_v13 }
 0x2dd   :  { %v439_v0 = vpop.permute.xlu1 %438  ;;  %v437_v28 = vsel %vm408_vm8, 0.0, %v433_v25 }
 0x2de   :  { %v450_v16 = vadd.f32 %v439_v0, %v401_v14 }
 0x2e1   :  { %v443_v5 = vpop.permute.xlu1 %442 }
 0x2e2   :  { %v452_v7 = vadd.f32 %v443_v5, %v403_v6 }
 0x2e4   :  { %v456_v9 = vadd.f32 %v452_v7, %v430_v8 }
 0x2e5   :  { %v416_v12 = vpop.permute.xlu1 %415 }
 0x2e6   :  { %v426_v15 = vrot.slane %v416_v12, 1  ;;  %490 = vxpose.xlu0.b32.start [1/2] (short) (narrow) %v456_v9, 8 }
 0x2e8   :  { %v431_v17 = vsel %vm429_vm5, %v426_v15, %v427_v4  ;;  %v432_v18 = vsel %vm429_vm5, %v425_v13, %v426_v15 }
 0x2e9   :  { %v441_v20 = vpop.permute.xlu1 %440  ;;  %v454_v21 = vadd.f32 %v450_v16, %v432_v18  ;;  %v435_v23 = vsel %vm406_vm7, 0.0, %v431_v17 }
 0x2ea   :  { %v451_v22 = vadd.f32 %v441_v20, %v399_v58 }
 0x2eb   :  { %458 = vxpose.xlu1.b32.start [1/2] (short) (narrow) %v454_v21, 8 }
 0x2ec   :  { %v455_v24 = vadd.f32 %v451_v22, %v435_v23 }
 0x2ed   :  { %v445_v26 = vpop.permute.xlu1 %444 }
 0x2ee   :  { %v453_v27 = vadd.f32 %v445_v26, %v397_v56 }
 0x2ef   :  { %459 = vxpose.xlu1.b32.end [2/2] (short) (narrow) %v455_v24, 8 }
 0x2f0   :  { %v457_v29 = vadd.f32 %v453_v27, %v437_v28 }
 0x2f2   :  { %491 = vxpose.xlu0.b32.end [2/2] (short) (narrow) %v457_v29, 8 }
 0x367   :  { %v474_v30 = vpop.trf.xlu1 }
 0x368   :  { %523 = vst.msk [vmem:[#allocation11] sm:$0xf] %vm522_vm9, %v474_v30 }
 0x36a   :  { %v506_v31 = vpop.trf.xlu0 }
 0x36b   :  { %524 = vst.msk [vmem:[#allocation11 + $0x4] sm:$0xf] %vm522_vm9, %v506_v31 }
 0x36c   :  { %695 = shalt.err (!%p692_p1)
}
 0x36d   :  { %536 = dma.vmem_to_hbm [thread:$0]  %s531_s9, 128, %s803_s7, [#allocation4], %s715_s1, %s715_s1, %s716_s16  }
 0x36e   :  { %710 = dma.done.wait [#allocation4], 128  }
 0x36f   :  { %711 = vsyncadd [#allocation4], 4294967168 }
 0x370   :  { %540 = vsyncpa [#allocation3], 1 }
 0x371   :  { %541 = vsyncpa [#allocation6], 1 }
 0x372   :  { %542 = vsyncpa [#allocation9], 1 }
 0x373   :  { %543 = vsyncpa [#allocation4], 1 }

</bundles_post_ra>
